<compile_context>
chip_gen: v6e
topology: v6e:2x2x1
jax: 0.10.0
libtpu: 0.0.40
codegen_flags: <defaults>
</compile_context>

<pallas_src>
import functools

import jax
import jax.numpy as jnp
from jax.experimental import pallas as pl
from jax.experimental.pallas import tpu as pltpu


def _resmps_kernel(x_ref, wf_ref, tc2_ref, out_ref, *,
                   L, pos_c, d, chi, classes, n_steps):
    """Whole forward pass for one batch tile (batch N on the lane axis).

    x_ref  : (L*d, Nb) f32   row n*d + b  = x[:, b, n]
    wf_ref : (n_steps, 2*chi, 2*d*chi) bf16  block-diag fused sweep cores:
               [0:chi, 0:d*chi]        = tl[i]      (tl[i][c, b*chi+a] = T_i[a,b,c])
               [chi:, d*chi:]          = tr[L-1-i]  (tr[n][a, b*chi+c] = T_n[a,b,c])
               zero block for padded steps of the shorter sweep.
    tc2_ref: (classes*chi, d*chi) bf16   tc2[c*chi+e, b*chi+a] = Tc[a,b,c,e]
    out_ref: (classes, Nb) f32
    """
    Nb = x_ref.shape[1]
    f32 = jnp.float32
    bf16 = jnp.bfloat16

    vL = jnp.full((chi, Nb), 1.0 / chi, dtype=f32)
    vR = jnp.full((chi, Nb), 1.0 / chi, dtype=f32)

    def dfuse(v, xn):
        # v: (chi, Nb), xn: (d, Nb) -> (d*chi, Nb), row b*chi + a = xn[b] * v[a].
        # Leading-dim merge is layout-preserving (chi % 8 == 0), lanes untouched.
        return (xn[:, None, :] * v[None, :, :]).reshape(d * chi, Nb)

    # ---- fused left/right residual sweeps (independent chains, one MXU push each)
    for i in range(n_steps):                     # static, fully unrolled
        nl = i
        nr = L - 1 - i
        xl = x_ref[nl * d:(nl + 1) * d, :]       # (d, Nb)
        xr = x_ref[nr * d:(nr + 1) * d, :]       # (d, Nb)
        rhs = jnp.concatenate([dfuse(vL, xl), dfuse(vR, xr)],
                              axis=0).astype(bf16)            # (2*d*chi, Nb)
        dv = jnp.dot(wf_ref[i], rhs, preferred_element_type=f32)  # (2*chi, Nb)
        vL = vL + dv[:chi, :]
        vR = vR + dv[chi:, :]

    # ---- center: out[c,n] = sum_{a,b,e} Tc[a,b,c,e] vL[a,n] xc[b,n] vR[e,n]
    xc = x_ref[pos_c * d:(pos_c + 1) * d, :]                     # (d, Nb)
    wc = dfuse(vL, xc).astype(bf16)                              # (d*chi, Nb)
    m2 = jnp.dot(tc2_ref[...], wc, preferred_element_type=f32)   # (classes*chi, Nb)
    m3 = m2.reshape(classes, chi, Nb)
    out_ref[...] = jnp.sum(m3 * vR[None, :, :], axis=1).astype(out_ref.dtype)

    # TODO(synk): bias / dropout / last_fc branches are off under the default
    # ResMPS params and are therefore not implemented in-kernel (padded batch
    # lanes would need explicit masking if they were added).


def resmps_forward(x, tensors, center_tensor, pos_c, block_n=1024):
    """x: (N, d, L); tensors: (L, chi, d, chi) (center slot unused);
    center_tensor: (chi, d, classes, chi).  Returns (N, classes) float32."""
    N, d, L = x.shape
    chi = tensors.shape[1]
    classes = center_tensor.shape[2]

    # Batch tile on the lane axis; keep >=2 grid steps when N allows so the
    # "parallel" batch axis can shard across v7x's two TensorCores.
    n128 = ((N + 127) // 128) * 128
    bn = min(block_n, max(128, ((n128 // 2 + 127) // 128) * 128))
    n_pad = ((N + bn - 1) // bn) * bn

    # x flattened to (L*d, N): sublane-dense tile, one contiguous HBM->VMEM copy.
    x32 = x.astype(jnp.float32)
    x_t = jnp.transpose(x32, (2, 1, 0)).reshape(L * d, N)   # row n*d+b = x[:, b, n]
    if n_pad != N:
        x_t = jnp.pad(x_t, ((0, 0), (0, n_pad - N)))        # zero cols -> out 0

    t32 = tensors.astype(jnp.float32)
    # Left-sweep core: tl[n][c, b*chi+a] = T_n[a,b,c]
    tl = jnp.transpose(t32, (0, 3, 2, 1)).reshape(L, chi, d * chi)
    # Right-sweep core is a plain reshape: tr[n][a, b*chi+c] = T_n[a,b,c]
    tr = t32.reshape(L, chi, d * chi)

    # Block-diagonal fused sweep weights; the shorter sweep gets zero blocks
    # on its padded steps (adds exactly 0 to its vector -> semantics preserved).
    n_left = pos_c
    n_right = L - 1 - pos_c
    n_steps = max(n_left, n_right, 1)
    wf = jnp.zeros((n_steps, 2 * chi, 2 * d * chi), jnp.float32)
    for i in range(n_steps):
        if i < n_left:
            wf = wf.at[i, :chi, :d * chi].set(tl[i])
        if i < n_right:
            wf = wf.at[i, chi:, d * chi:].set(tr[L - 1 - i])
    wf = wf.astype(jnp.bfloat16)

    # Center core: tc2[c*chi+e, b*chi+a] = Tc[a,b,c,e]  -> (classes*chi, d*chi)
    tc2 = jnp.transpose(center_tensor.astype(jnp.float32),
                        (2, 3, 1, 0)).reshape(classes * chi, d * chi)
    tc2 = tc2.astype(jnp.bfloat16)

    kernel = functools.partial(_resmps_kernel, L=L, pos_c=pos_c, d=d, chi=chi,
                               classes=classes, n_steps=n_steps)

    out = pl.pallas_call(
        kernel,
        out_shape=jax.ShapeDtypeStruct((classes, n_pad), jnp.float32),
        grid=(n_pad // bn,),
        in_specs=[
            pl.BlockSpec((L * d, bn), lambda i: (0, i)),                      # x tile
            pl.BlockSpec((n_steps, 2 * chi, 2 * d * chi), lambda i: (0, 0, 0)),  # fused cores (resident)
            pl.BlockSpec((classes * chi, d * chi), lambda i: (0, 0)),         # center core (resident)
        ],
        out_specs=pl.BlockSpec((classes, bn), lambda i: (0, i)),
        compiler_params=pltpu.CompilerParams(
            dimension_semantics=("parallel",)),
    )(x_t, wf, tc2)

    return jnp.transpose(out[:, :N])                          # (N, classes)


def resmps_ref(x, tensors, center_tensor, pos_c):
    """Pure-JAX f32 reference mirroring the PyTorch forward (bias/dropout/fc off)."""
    N, d, L = x.shape
    chi = tensors.shape[1]
    vL = jnp.full((N, chi), 1.0 / chi, dtype=x.dtype)
    for n in range(pos_c):
        vL = vL + jnp.einsum('abc,na,nb->nc', tensors[n], vL, x[:, :, n])
    vR = jnp.full((N, chi), 1.0 / chi, dtype=x.dtype)
    for n in range(L - 1, pos_c, -1):
        vR = vR + jnp.einsum('abc,nc,nb->na', tensors[n], vR, x[:, :, n])
    return jnp.einsum('abcd,na,nb,nd->nc', center_tensor, vL, x[:, :, pos_c], vR)


if __name__ == "__main__":
    # Small deterministic problem: batch=2, physical dim d=2, length L=8,
    # bond dim chi=32, classes=2 (module defaults, pos_c = round(L/2)).
    N, d, L, chi, classes = 2, 2, 8, 32, 2
    eps = 0.01
    pos_c = round(L / 2)

    key = jax.random.PRNGKey(0)
    kx, kt, kc = jax.random.split(key, 3)
    x = jax.random.normal(kx, (N, d, L), dtype=jnp.float32)
    # Non-center MPS cores are scaled by eps (tensors2ParameterList); the
    # center core is NOT scaled when fc is None.
    tensors = eps * jax.random.normal(kt, (L, chi, d, chi), dtype=jnp.float32)
    center_tensor = jax.random.normal(kc, (chi, d, classes, chi), dtype=jnp.float32)

    out = resmps_forward(x, tensors, center_tensor, pos_c)
    out = jax.block_until_ready(out)

    ref = resmps_ref(x, tensors, center_tensor, pos_c)
    assert out.shape == (N, classes)
    # bf16 MXU operands with f32 accumulation: expect <~1% relative error.
    assert jnp.allclose(out, ref, rtol=3e-2, atol=3e-3), (out, ref)
    print("KERNEL_OK")
</pallas_src>

<mosaic_0001>
module attributes {stable_mosaic.version = 11 : i64} {
  func.func @_resmps_kernel(%arg0: i32, %arg1: memref<16x128xf32, #tpu.memory_space<vmem>>, %arg2: memref<4x64x128xbf16, #tpu.memory_space<vmem>>, %arg3: memref<64x64xbf16, #tpu.memory_space<vmem>>, %arg4: memref<2x128xf32, #tpu.memory_space<vmem>>) attributes {dimension_semantics = [#tpu.dimension_semantics<parallel>], iteration_bounds = array<i64: 1>, scalar_prefetch = 0 : i64, scratch_operands = 0 : i64, tpu.core_type = #tpu.core_type<tc>, window_params = [{transform_indices = @transform_0, window_bounds = array<i64: 16, 128>}, {pipeline_mode = #tpu.pipeline_mode<synchronous>, transform_indices = @transform_1, window_bounds = array<i64: 4, 64, 128>}, {pipeline_mode = #tpu.pipeline_mode<synchronous>, transform_indices = @transform_2, window_bounds = array<i64: 64, 64>}, {transform_indices = @transform_3, window_bounds = array<i64: 2, 128>}]} {
    %cst = arith.constant 3.125000e-02 : f32
    %0 = vector.broadcast %cst : f32 to vector<32x128xf32>
    %cst_0 = arith.constant 3.125000e-02 : f32
    %1 = vector.broadcast %cst_0 : f32 to vector<32x128xf32>
    %c0 = arith.constant 0 : index
    %c0_1 = arith.constant 0 : index
    %2 = vector.load %arg1[%c0, %c0_1] : memref<16x128xf32, #tpu.memory_space<vmem>>, vector<2x128xf32>
    %c14 = arith.constant 14 : index
    %c0_2 = arith.constant 0 : index
    %3 = vector.load %arg1[%c14, %c0_2] : memref<16x128xf32, #tpu.memory_space<vmem>>, vector<2x128xf32>
    %4 = vector.shape_cast %2 : vector<2x128xf32> to vector<2x1x128xf32>
    %5 = vector.shape_cast %0 : vector<32x128xf32> to vector<1x32x128xf32>
    %6 = vector.broadcast %4 : vector<2x1x128xf32> to vector<2x32x128xf32>
    %7 = vector.broadcast %5 : vector<1x32x128xf32> to vector<2x32x128xf32>
    %8 = arith.mulf %6, %7 : vector<2x32x128xf32>
    %9 = vector.shape_cast %8 : vector<2x32x128xf32> to vector<64x128xf32>
    %10 = vector.shape_cast %3 : vector<2x128xf32> to vector<2x1x128xf32>
    %11 = vector.shape_cast %1 : vector<32x128xf32> to vector<1x32x128xf32>
    %12 = vector.broadcast %10 : vector<2x1x128xf32> to vector<2x32x128xf32>
    %13 = vector.broadcast %11 : vector<1x32x128xf32> to vector<2x32x128xf32>
    %14 = arith.mulf %12, %13 : vector<2x32x128xf32>
    %15 = vector.shape_cast %14 : vector<2x32x128xf32> to vector<64x128xf32>
    %16 = tpu.concatenate %9, %15 in 0 : vector<64x128xf32>, vector<64x128xf32> -> vector<128x128xf32>
    %17 = arith.truncf %16 : vector<128x128xf32> to vector<128x128xbf16>
    %c0_3 = arith.constant 0 : index
    %c0_4 = arith.constant 0 : index
    %c0_5 = arith.constant 0 : index
    %18 = vector.load %arg2[%c0_3, %c0_4, %c0_5] : memref<4x64x128xbf16, #tpu.memory_space<vmem>>, vector<1x64x128xbf16>
    %19 = vector.shape_cast %18 : vector<1x64x128xbf16> to vector<64x128xbf16>
    %cst_6 = arith.constant dense<0.000000e+00> : vector<64x128xf32>
    %20 = tpu.matmul %19, %17, %cst_6 {dimension_numbers = #tpu.dot_dimension_numbers<[1], [0], [0], [1], [0, 0, 1, 1], [], []>} : vector<64x128xbf16>, vector<128x128xbf16>, vector<64x128xf32> -> vector<64x128xf32>
    %21 = vector.extract_strided_slice %20 {offsets = [0, 0], sizes = [32, 128], strides = [1, 1]} : vector<64x128xf32> to vector<32x128xf32>
    %22 = arith.addf %0, %21 : vector<32x128xf32>
    %23 = vector.extract_strided_slice %20 {offsets = [32, 0], sizes = [32, 128], strides = [1, 1]} : vector<64x128xf32> to vector<32x128xf32>
    %24 = arith.addf %1, %23 : vector<32x128xf32>
    %c2 = arith.constant 2 : index
    %c0_7 = arith.constant 0 : index
    %25 = vector.load %arg1[%c2, %c0_7] : memref<16x128xf32, #tpu.memory_space<vmem>>, vector<2x128xf32>
    %c12 = arith.constant 12 : index
    %c0_8 = arith.constant 0 : index
    %26 = vector.load %arg1[%c12, %c0_8] : memref<16x128xf32, #tpu.memory_space<vmem>>, vector<2x128xf32>
    %27 = vector.shape_cast %25 : vector<2x128xf32> to vector<2x1x128xf32>
    %28 = vector.shape_cast %22 : vector<32x128xf32> to vector<1x32x128xf32>
    %29 = vector.broadcast %27 : vector<2x1x128xf32> to vector<2x32x128xf32>
    %30 = vector.broadcast %28 : vector<1x32x128xf32> to vector<2x32x128xf32>
    %31 = arith.mulf %29, %30 : vector<2x32x128xf32>
    %32 = vector.shape_cast %31 : vector<2x32x128xf32> to vector<64x128xf32>
    %33 = vector.shape_cast %26 : vector<2x128xf32> to vector<2x1x128xf32>
    %34 = vector.shape_cast %24 : vector<32x128xf32> to vector<1x32x128xf32>
    %35 = vector.broadcast %33 : vector<2x1x128xf32> to vector<2x32x128xf32>
    %36 = vector.broadcast %34 : vector<1x32x128xf32> to vector<2x32x128xf32>
    %37 = arith.mulf %35, %36 : vector<2x32x128xf32>
    %38 = vector.shape_cast %37 : vector<2x32x128xf32> to vector<64x128xf32>
    %39 = tpu.concatenate %32, %38 in 0 : vector<64x128xf32>, vector<64x128xf32> -> vector<128x128xf32>
    %40 = arith.truncf %39 : vector<128x128xf32> to vector<128x128xbf16>
    %c1 = arith.constant 1 : index
    %c0_9 = arith.constant 0 : index
    %c0_10 = arith.constant 0 : index
    %41 = vector.load %arg2[%c1, %c0_9, %c0_10] : memref<4x64x128xbf16, #tpu.memory_space<vmem>>, vector<1x64x128xbf16>
    %42 = vector.shape_cast %41 : vector<1x64x128xbf16> to vector<64x128xbf16>
    %cst_11 = arith.constant dense<0.000000e+00> : vector<64x128xf32>
    %43 = tpu.matmul %42, %40, %cst_11 {dimension_numbers = #tpu.dot_dimension_numbers<[1], [0], [0], [1], [0, 0, 1, 1], [], []>} : vector<64x128xbf16>, vector<128x128xbf16>, vector<64x128xf32> -> vector<64x128xf32>
    %44 = vector.extract_strided_slice %43 {offsets = [0, 0], sizes = [32, 128], strides = [1, 1]} : vector<64x128xf32> to vector<32x128xf32>
    %45 = arith.addf %22, %44 : vector<32x128xf32>
    %46 = vector.extract_strided_slice %43 {offsets = [32, 0], sizes = [32, 128], strides = [1, 1]} : vector<64x128xf32> to vector<32x128xf32>
    %47 = arith.addf %24, %46 : vector<32x128xf32>
    %c4 = arith.constant 4 : index
    %c0_12 = arith.constant 0 : index
    %48 = vector.load %arg1[%c4, %c0_12] : memref<16x128xf32, #tpu.memory_space<vmem>>, vector<2x128xf32>
    %c10 = arith.constant 10 : index
    %c0_13 = arith.constant 0 : index
    %49 = vector.load %arg1[%c10, %c0_13] : memref<16x128xf32, #tpu.memory_space<vmem>>, vector<2x128xf32>
    %50 = vector.shape_cast %48 : vector<2x128xf32> to vector<2x1x128xf32>
    %51 = vector.shape_cast %45 : vector<32x128xf32> to vector<1x32x128xf32>
    %52 = vector.broadcast %50 : vector<2x1x128xf32> to vector<2x32x128xf32>
    %53 = vector.broadcast %51 : vector<1x32x128xf32> to vector<2x32x128xf32>
    %54 = arith.mulf %52, %53 : vector<2x32x128xf32>
    %55 = vector.shape_cast %54 : vector<2x32x128xf32> to vector<64x128xf32>
    %56 = vector.shape_cast %49 : vector<2x128xf32> to vector<2x1x128xf32>
    %57 = vector.shape_cast %47 : vector<32x128xf32> to vector<1x32x128xf32>
    %58 = vector.broadcast %56 : vector<2x1x128xf32> to vector<2x32x128xf32>
    %59 = vector.broadcast %57 : vector<1x32x128xf32> to vector<2x32x128xf32>
    %60 = arith.mulf %58, %59 : vector<2x32x128xf32>
    %61 = vector.shape_cast %60 : vector<2x32x128xf32> to vector<64x128xf32>
    %62 = tpu.concatenate %55, %61 in 0 : vector<64x128xf32>, vector<64x128xf32> -> vector<128x128xf32>
    %63 = arith.truncf %62 : vector<128x128xf32> to vector<128x128xbf16>
    %c2_14 = arith.constant 2 : index
    %c0_15 = arith.constant 0 : index
    %c0_16 = arith.constant 0 : index
    %64 = vector.load %arg2[%c2_14, %c0_15, %c0_16] : memref<4x64x128xbf16, #tpu.memory_space<vmem>>, vector<1x64x128xbf16>
    %65 = vector.shape_cast %64 : vector<1x64x128xbf16> to vector<64x128xbf16>
    %cst_17 = arith.constant dense<0.000000e+00> : vector<64x128xf32>
    %66 = tpu.matmul %65, %63, %cst_17 {dimension_numbers = #tpu.dot_dimension_numbers<[1], [0], [0], [1], [0, 0, 1, 1], [], []>} : vector<64x128xbf16>, vector<128x128xbf16>, vector<64x128xf32> -> vector<64x128xf32>
    %67 = vector.extract_strided_slice %66 {offsets = [0, 0], sizes = [32, 128], strides = [1, 1]} : vector<64x128xf32> to vector<32x128xf32>
    %68 = arith.addf %45, %67 : vector<32x128xf32>
    %69 = vector.extract_strided_slice %66 {offsets = [32, 0], sizes = [32, 128], strides = [1, 1]} : vector<64x128xf32> to vector<32x128xf32>
    %70 = arith.addf %47, %69 : vector<32x128xf32>
    %c6 = arith.constant 6 : index
    %c0_18 = arith.constant 0 : index
    %71 = vector.load %arg1[%c6, %c0_18] : memref<16x128xf32, #tpu.memory_space<vmem>>, vector<2x128xf32>
    %c8 = arith.constant 8 : index
    %c0_19 = arith.constant 0 : index
    %72 = vector.load %arg1[%c8, %c0_19] : memref<16x128xf32, #tpu.memory_space<vmem>>, vector<2x128xf32>
    %73 = vector.shape_cast %71 : vector<2x128xf32> to vector<2x1x128xf32>
    %74 = vector.shape_cast %68 : vector<32x128xf32> to vector<1x32x128xf32>
    %75 = vector.broadcast %73 : vector<2x1x128xf32> to vector<2x32x128xf32>
    %76 = vector.broadcast %74 : vector<1x32x128xf32> to vector<2x32x128xf32>
    %77 = arith.mulf %75, %76 : vector<2x32x128xf32>
    %78 = vector.shape_cast %77 : vector<2x32x128xf32> to vector<64x128xf32>
    %79 = vector.shape_cast %72 : vector<2x128xf32> to vector<2x1x128xf32>
    %80 = vector.shape_cast %70 : vector<32x128xf32> to vector<1x32x128xf32>
    %81 = vector.broadcast %79 : vector<2x1x128xf32> to vector<2x32x128xf32>
    %82 = vector.broadcast %80 : vector<1x32x128xf32> to vector<2x32x128xf32>
    %83 = arith.mulf %81, %82 : vector<2x32x128xf32>
    %84 = vector.shape_cast %83 : vector<2x32x128xf32> to vector<64x128xf32>
    %85 = tpu.concatenate %78, %84 in 0 : vector<64x128xf32>, vector<64x128xf32> -> vector<128x128xf32>
    %86 = arith.truncf %85 : vector<128x128xf32> to vector<128x128xbf16>
    %c3 = arith.constant 3 : index
    %c0_20 = arith.constant 0 : index
    %c0_21 = arith.constant 0 : index
    %87 = vector.load %arg2[%c3, %c0_20, %c0_21] : memref<4x64x128xbf16, #tpu.memory_space<vmem>>, vector<1x64x128xbf16>
    %88 = vector.shape_cast %87 : vector<1x64x128xbf16> to vector<64x128xbf16>
    %cst_22 = arith.constant dense<0.000000e+00> : vector<64x128xf32>
    %89 = tpu.matmul %88, %86, %cst_22 {dimension_numbers = #tpu.dot_dimension_numbers<[1], [0], [0], [1], [0, 0, 1, 1], [], []>} : vector<64x128xbf16>, vector<128x128xbf16>, vector<64x128xf32> -> vector<64x128xf32>
    %90 = vector.extract_strided_slice %89 {offsets = [0, 0], sizes = [32, 128], strides = [1, 1]} : vector<64x128xf32> to vector<32x128xf32>
    %91 = arith.addf %68, %90 : vector<32x128xf32>
    %92 = vector.extract_strided_slice %89 {offsets = [32, 0], sizes = [32, 128], strides = [1, 1]} : vector<64x128xf32> to vector<32x128xf32>
    %93 = arith.addf %70, %92 : vector<32x128xf32>
    %c8_23 = arith.constant 8 : index
    %c0_24 = arith.constant 0 : index
    %94 = vector.load %arg1[%c8_23, %c0_24] : memref<16x128xf32, #tpu.memory_space<vmem>>, vector<2x128xf32>
    %95 = vector.shape_cast %94 : vector<2x128xf32> to vector<2x1x128xf32>
    %96 = vector.shape_cast %91 : vector<32x128xf32> to vector<1x32x128xf32>
    %97 = vector.broadcast %95 : vector<2x1x128xf32> to vector<2x32x128xf32>
    %98 = vector.broadcast %96 : vector<1x32x128xf32> to vector<2x32x128xf32>
    %99 = arith.mulf %97, %98 : vector<2x32x128xf32>
    %100 = vector.shape_cast %99 : vector<2x32x128xf32> to vector<64x128xf32>
    %101 = arith.truncf %100 : vector<64x128xf32> to vector<64x128xbf16>
    %c0_25 = arith.constant 0 : index
    %c0_26 = arith.constant 0 : index
    %102 = vector.load %arg3[%c0_25, %c0_26] : memref<64x64xbf16, #tpu.memory_space<vmem>>, vector<64x64xbf16>
    %cst_27 = arith.constant dense<0.000000e+00> : vector<64x128xf32>
    %103 = tpu.matmul %102, %101, %cst_27 {dimension_numbers = #tpu.dot_dimension_numbers<[1], [0], [0], [1], [0, 0, 1, 1], [], []>} : vector<64x64xbf16>, vector<64x128xbf16>, vector<64x128xf32> -> vector<64x128xf32>
    %104 = vector.shape_cast %103 : vector<64x128xf32> to vector<2x32x128xf32>
    %105 = vector.shape_cast %93 : vector<32x128xf32> to vector<1x32x128xf32>
    %106 = vector.broadcast %105 : vector<1x32x128xf32> to vector<2x32x128xf32>
    %107 = arith.mulf %104, %106 : vector<2x32x128xf32>
    %cst_28 = arith.constant dense<0.000000e+00> : vector<2x128xf32>
    %108 = vector.multi_reduction <add>, %107, %cst_28 [1] : vector<2x32x128xf32> to vector<2x128xf32>
    %c0_29 = arith.constant 0 : index
    %c0_30 = arith.constant 0 : index
    %109 = vector.load %arg4[%c0_29, %c0_30] : memref<2x128xf32, #tpu.memory_space<vmem>>, vector<2x128xf32>
    tpu.vector_store %arg4[%c0_29, %c0_30], %108 {strides = array<i32>} : memref<2x128xf32, #tpu.memory_space<vmem>>, vector<2x128xf32>,
    return
  }
  func.func @transform_0(%arg0: i32) -> (i32, i32) {
    %c0_i32 = arith.constant 0 : i32
    %c0_i32_0 = arith.constant 0 : i32
    return %c0_i32, %arg0 : i32, i32
  }
  func.func @transform_1(%arg0: i32) -> (i32, i32, i32) {
    %c0_i32 = arith.constant 0 : i32
    %c0_i32_0 = arith.constant 0 : i32
    %c0_i32_1 = arith.constant 0 : i32
    %c0_i32_2 = arith.constant 0 : i32
    return %c0_i32, %c0_i32_0, %c0_i32_1 : i32, i32, i32
  }
  func.func @transform_2(%arg0: i32) -> (i32, i32) {
    %c0_i32 = arith.constant 0 : i32
    %c0_i32_0 = arith.constant 0 : i32
    %c0_i32_1 = arith.constant 0 : i32
    return %c0_i32, %c0_i32_0 : i32, i32
  }
  func.func @transform_3(%arg0: i32) -> (i32, i32) {
    %c0_i32 = arith.constant 0 : i32
    %c0_i32_0 = arith.constant 0 : i32
    return %c0_i32, %arg0 : i32, i32
  }
}

</mosaic_0001>

<bundles_post_ra>
// kernel: tpu_custom_call.1
= control target key start
LH: loop header
LB: loop body
LE: loop exit
PB: predicated region body
PF: predicated region fallthrough
CT: control target
= control target key end

     0   :  { %8 = vsyncpa [#allocation3], 0  ;;  %s1522_s0 = inlined_call_operand.hbm [shape: f32[16,128], index: 0, kind: input, shape index: {}]   ;;  %s1523_s1 = inlined_call_operand.hbm [shape: bf16[4,64,128], index: 1, kind: input, shape index: {}]   ;;  %s1524_s2 = inlined_call_operand.hbm [shape: bf16[64,64], index: 2, kind: input, shape index: {}]   ;;  %s1525_s3 = inlined_call_operand.hbm [shape: f32[2,128], index: 3, kind: output, shape index: {}]  }
   0x1   :  { %9 = vsyncpa [#allocation6], 0 }
   0x2   :  { %10 = vsyncpa [#allocation4], 0  ;;  %s1321_s12 = smov [#allocation5]  }
   0x3   :  { %s28_s13 = sshll.u32 %s1321_s12, 4  ;;  %s29_s13 = int_to_ptr.vmem [resolvable:$true] %s28_s13 }
   0x4   :  { %s1243_s14 = scalar_lea.vmem %s29_s13, 2048  ;;  %p1248_p1 = scmp.lt.s32.totalorder %s29_s13, %s29_s13 }
   0x5   :  { %p1244_p0 = scmp.ne.s32.totalorder %s29_s13, %s1243_s14  ;;  %p1249_p2 = scmp.lt.s32.totalorder %s1243_s14, %s1243_s14 }
   0x7   :  { %p1250_p3 = por %p1249_p2, %p1248_p1 }
   0x9   :  { %p1251_p4 = pnand %p1250_p3, %p1244_p0 }
   0xb   :  { %1254 = shalt.err (!%p1251_p4)
}
   0xc   :  { %s1322_s15 = smov 64   ;;  %s1323_s16 = smov 4  }
   0xd   :  { %34 = dma.hbm_to_vmem [thread:$0]  %s1523_s1, 2048, %s29_s13, [#allocation6], %s1322_s15, %s1322_s15, %s1323_s16  }
   0xe   :  { %s1324_s19 = smov [#allocation2]  }
   0xf   :  { %s16_s20 = sshll.u32 %s1324_s19, 4  ;;  %s17_s20 = int_to_ptr.vmem [resolvable:$true] %s16_s20 }
  0x10   :  { %s1263_s21 = scalar_lea.vmem %s17_s20, 256  ;;  %p1268_p6 = scmp.lt.s32.totalorder %s17_s20, %s17_s20 }
  0x11   :  { %p1264_p5 = scmp.ne.s32.totalorder %s17_s20, %s1263_s21  ;;  %p1269_p7 = scmp.lt.s32.totalorder %s1263_s21, %s1263_s21 }
  0x13   :  { %p1270_p8 = por %p1269_p7, %p1268_p6 }
  0x15   :  { %p1271_p9 = pnand %p1270_p8, %p1264_p5 }
  0x17   :  { %1274 = shalt.err (!%p1271_p9)
}
  0x18   :  { %s1325_s22 = smov 128   ;;  %s1326_s23 = smov 8  }
  0x19   :  { %22 = dma.hbm_to_vmem [thread:$0]  %s1522_s0, 256, %s17_s20, [#allocation3], %s1325_s22, %s1325_s22, %s1326_s23  }
  0x1a   :  { %s1327_s26 = smov [#allocation7]  }
  0x1b   :  { %s40_s27 = sshll.u32 %s1327_s26, 4  ;;  %s41_s27 = int_to_ptr.vmem [resolvable:$true] %s40_s27 }
  0x1c   :  { %s1283_s1 = scalar_lea.vmem %s41_s27, 512  ;;  %p1288_p11 = scmp.lt.s32.totalorder %s41_s27, %s41_s27 }
  0x1d   :  { %p1284_p10 = scmp.ne.s32.totalorder %s41_s27, %s1283_s1  ;;  %p1289_p12 = scmp.lt.s32.totalorder %s1283_s1, %s1283_s1 }
  0x1f   :  { %p1290_p13 = por %p1289_p12, %p1288_p11 }
  0x21   :  { %p1291_p0 = pnand %p1290_p13, %p1284_p10 }
  0x23   :  { %1294 = shalt.err (!%p1291_p0)
}
  0x24   :  { %46 = dma.hbm_to_vmem [thread:$0]  %s1524_s2, 512, %s41_s27, [#allocation6], %s1322_s15, %s1322_s15, %s1323_s16  }
  0x25   :  { %1315 = dma.done.wait [#allocation3], 256  }
  0x26   :  { %1316 = vsyncadd [#allocation3], 4294967040 }
  0x27   :  { %1317 = dma.done.wait [#allocation6], 2560  }
  0x28   :  { %1318 = vsyncadd [#allocation6], 4294964736  ;;  %v71_v0 = vlaneseq  ;;  %v1328_v1 = vmov 1966171168   ;;  %v1215_v11 = vld [vmem:[#allocation5] sm:$0xff]   ;;  %v1216_v28 = vld [vmem:[#allocation5 + $0x8] sm:$0xff]  }
  0x29   :  { %v69_v2 = vunpack.c.l.s4 %v1328_v1  ;;  %v999_v7 = vld.sshfl [vmem:[#allocation2 + $0xe] sm:$0x11 pattern:$0x75316420]  ;;  %1102 = vmatprep.mubr.bf16.mxu0 %v1215_v11  ;;  %v1217_v29 = vld [vmem:[#allocation5 + $0x10] sm:$0xff]   ;;  %v1219_v31 = vld [vmem:[#allocation5 + $0x20] sm:$0xff]  }
  0x2a   :  { %v72_v3 = vshrl.u32 %v71_v0, 7  ;;  %v102_v8 = vcombine.high %v999_v7, %v999_v7  ;;  %v998_v10 = vld.sshfl [vmem:[#allocation2] sm:$0x11 pattern:$0x75316420]  ;;  %v1218_v30 = vld [vmem:[#allocation5 + $0x18] sm:$0xff]   ;;  %1126 = vmatprep.mubr.bf16.mxu1 %v1219_v31 }
  0x2b   :  { %v70_v4 = vunpack.c.0.s8 %v69_v2  ;;  %v67_v15 = vcombine.high %v998_v10, %v998_v10  ;;  %v1005_v33 = vld.sshfl [vmem:[#allocation2 + $0xc] sm:$0x11 pattern:$0x75316420]  ;;  %vm872_vm0 = vcmask 523264   ;;  %s1329_s0 = smov [#allocation8]  }
  0x2c   :  { %v1361_v6 = vsub.s32 0, %v72_v3  ;;  %v289_v35 = vcombine.high %v1005_v33, %v1005_v33  ;;  %v1004_v44 = vld.sshfl [vmem:[#allocation2 + $0x2] sm:$0x11 pattern:$0x75316420]  ;;  %s988_s2 = sshll.u32 %s1329_s0, 4  ;;  %s989_s2 = int_to_ptr.vmem [resolvable:$true] %s988_s2 }
  0x2d   :  { %v1359_v5 = vsub.s32 %v70_v4, %v72_v3  ;;  %v248_v52 = vcombine.high %v1004_v44, %v1004_v44  ;;  %vm978_vm1 = vcmask 1041409   ;;  %s1295_s30 = scalar_lea.vmem %s989_s2, 32  ;;  %p1300_p2 = scmp.lt.s32.totalorder %s989_s2, %s989_s2 }
  0x2e   :  { %p1296_p1 = scmp.ne.s32.totalorder %s989_s2, %s1295_s30  ;;  %p1301_p3 = scmp.lt.s32.totalorder %s1295_s30, %s1295_s30 }
  0x2f   :  { %v109_v9 = vrot.slane %v999_v7, %v1359_v5  ;;  %v116_v12 = vrot.slane %v102_v8, %v1359_v5  ;;  %v81_v19 = vrot.slane %v67_v15, %v1359_v5  ;;  %v74_v23 = vrot.slane %v998_v10, %v1359_v5 }
  0x30   :  { %v303_v38 = vrot.slane %v289_v35, %v1359_v5  ;;  %v296_v45 = vrot.slane %v1005_v33, %v1359_v5  ;;  %v262_v59 = vrot.slane %v248_v52, %v1359_v5  ;;  %v255_v8 = vrot.slane %v1004_v44, %v1359_v5  ;;  %p1302_p4 = por %p1301_p3, %p1300_p2 }
  0x31   :  { %v120_v13 = vrot.slane %v109_v9, %v1361_v6  ;;  %v124_v14 = vrot.slane %v116_v12, %v1361_v6  ;;  %v89_v21 = vrot.slane %v81_v19, %v1361_v6  ;;  %v85_v25 = vrot.slane %v74_v23, %v1361_v6  ;;  %v1221_v23 = vld [vmem:[#allocation5 + $0x30] sm:$0xff]  }
  0x32   :  { %v311_v42 = vrot.slane %v303_v38, %v1361_v6  ;;  %v307_v53 = vrot.slane %v296_v45, %v1361_v6  ;;  %v270_v1 = vrot.slane %v262_v59, %v1361_v6  ;;  %v1010_v38 = vld.sshfl [vmem:[#allocation2 + $0x4] sm:$0x11 pattern:$0x75316420]  ;;  %p1303_p5 = pnand %p1302_p4, %p1296_p1 }
  0x33   :  { %v128_v16 = vmul.f32 0.03125, %v124_v14  ;;  %v127_v17 = vmul.f32 0.03125, %v120_v13  ;;  %v93_v22 = vmul.f32 0.03125, %v89_v21  ;;  %v92_v26 = vmul.f32 0.03125, %v85_v25  ;;  %v1223_v25 = vld [vmem:[#allocation5 + $0x40] sm:$0xff]  }
  0x34   :  { %v266_v13 = vrot.slane %v255_v8, %v1361_v6 }
  0x35   :  { %v132_v18 = vpack.c.bf16 %v128_v16, %v128_v16  ;;  %v131_v20 = vpack.c.bf16 %v127_v17, %v127_v17  ;;  %v130_v24 = vpack.c.bf16 %v93_v22, %v93_v22  ;;  %v129_v27 = vpack.c.bf16 %v92_v26, %v92_v26  ;;  %v1220_v22 = vld [vmem:[#allocation5 + $0x28] sm:$0xff]  }
  0x37   :  { %1086 = vmatprep.subr.bf16.mxu0 %v132_v18 }
  0x38   :  { %1087 = vmatpush3.bf16.msra.mxu0 %v132_v18 }
  0x39   :  { %1088 = vmatprep.subr.bf16.mxu0 %v132_v18 }
  0x3c   :  { %1089 = vmatpush3.bf16.msra.mxu0 %v132_v18 }
  0x3d   :  { %1090 = vmatprep.subr.bf16.mxu0 %v131_v20 }
  0x40   :  { %1091 = vmatpush3.bf16.msra.mxu0 %v131_v20 }
  0x41   :  { %1092 = vmatprep.subr.bf16.mxu0 %v131_v20 }
  0x44   :  { %1093 = vmatpush3.bf16.msra.mxu0 %v131_v20 }
  0x45   :  { %1094 = vmatprep.subr.bf16.mxu0 %v130_v24 }
  0x48   :  { %1095 = vmatpush3.bf16.msra.mxu0 %v130_v24 }
  0x49   :  { %1096 = vmatprep.subr.bf16.mxu0 %v130_v24 }
  0x4c   :  { %1097 = vmatpush3.bf16.msra.mxu0 %v130_v24  ;;  %v1222_v24 = vld [vmem:[#allocation5 + $0x38] sm:$0xff]  }
  0x4d   :  { %1098 = vmatprep.subr.bf16.mxu0 %v129_v27 }
  0x50   :  { %1099 = vmatpush3.bf16.msra.mxu0 %v129_v27 }
  0x51   :  { %1100 = vmatprep.subr.bf16.mxu0 %v129_v27 }
  0x54   :  { %1101 = vmatpush3.bf16.msra.mxu0 %v129_v27  ;;  %v1011_v27 = vld.sshfl [vmem:[#allocation2 + $0xa] sm:$0x11 pattern:$0x75316420] }
  0x57   :  { %1103 = vmatmul.mubr.bf16.vlgmr.msra.gmra.mxu0 %v1216_v28 }
  0x58   :  { %1106 = vmatprep.mubr.bf16.mxu0 %v1217_v29  ;;  %v487_v29 = vcombine.high %v1011_v27, %v1011_v27 }
  0x5f   :  { %1107 = vmatmul.mubr.bf16.gmra.mxu0 %v1218_v30 }
  0x60   :  { %1150 = vmatprep.mubr.bf16.mxu0 %v1223_v25 }
 0x117   :  { %v1104_v32 = vpop.f32.mrf.mxu0 }
 0x118   :  { %v1393_v0 = vadd.f32 0.03125, %v1104_v32  ;;  %v501_v32 = vrot.slane %v487_v29, %v1359_v5 }
 0x119   :  { %v199_v34 = vpop.f32.mrf.mxu0 }
 0x11a   :  { %v279_v9 = vmul.f32 %v270_v1, %v1393_v0  ;;  %v1402_v10 = vadd.f32 0.03125, %v199_v34  ;;  %v275_v17 = vmul.f32 %v266_v13, %v1393_v0 }
 0x11b   :  { %v1105_v36 = vpop.f32.mrf.mxu0 }
 0x11c   :  { %v1390_v61 = vadd.f32 0.03125, %v1105_v36  ;;  %v277_v14 = vmul.f32 %v270_v1, %v1402_v10  ;;  %v273_v20 = vmul.f32 %v266_v13, %v1402_v10  ;;  %v509_v36 = vrot.slane %v501_v32, %v1361_v6  ;;  %v1016_v32 = vld.sshfl [vmem:[#allocation2 + $0x6] sm:$0x11 pattern:$0x75316420] }
 0x11d   :  { %v202_v37 = vpop.f32.mrf.mxu0 }
 0x11e   :  { %v280_v3 = vmul.f32 %v270_v1, %v1390_v61  ;;  %v1398_v4 = vadd.f32 0.03125, %v202_v37  ;;  %v276_v15 = vmul.f32 %v266_v13, %v1390_v61 }
 0x11f   :  { %v1108_v39 = vpop.f32.mrf.mxu0 }
 0x120   :  { %v1372_v41 = vadd.f32 0.03125, %v1108_v39  ;;  %v278_v11 = vmul.f32 %v270_v1, %v1398_v4  ;;  %v325_v12 = vpack.c.bf16 %v280_v3, %v279_v9  ;;  %v274_v18 = vmul.f32 %v266_v13, %v1398_v4 }
 0x121   :  { %v215_v40 = vpop.f32.mrf.mxu0  ;;  %v323_v19 = vpack.c.bf16 %v276_v15, %v275_v17  ;;  %v494_v39 = vrot.slane %v1011_v27, %v1359_v5  ;;  %v1225_v17 = vld [vmem:[#allocation5 + $0x50] sm:$0xff]  }
 0x122   :  { %v1376_v46 = vadd.f32 0.03125, %v215_v40  ;;  %v320_v50 = vmul.f32 %v311_v42, %v1372_v41  ;;  %v316_v60 = vmul.f32 %v307_v53, %v1372_v41  ;;  %v324_v16 = vpack.c.bf16 %v278_v11, %v277_v14 }
 0x123   :  { %v1109_v43 = vpop.f32.mrf.mxu0  ;;  %v322_v21 = vpack.c.bf16 %v274_v18, %v273_v20  ;;  %v1226_v18 = vld [vmem:[#allocation5 + $0x58] sm:$0xff]  }
 0x124   :  { %v1378_v47 = vadd.f32 0.03125, %v1109_v43  ;;  %v318_v54 = vmul.f32 %v311_v42, %v1376_v46  ;;  %v314_v2 = vmul.f32 %v307_v53, %v1376_v46 }
 0x125   :  { %v218_v48 = vpop.f32.mrf.mxu0 }
 0x126   :  { %v1380_v49 = vadd.f32 0.03125, %v218_v48  ;;  %v321_v51 = vmul.f32 %v311_v42, %v1378_v47  ;;  %v317_v57 = vmul.f32 %v307_v53, %v1378_v47  ;;  %v446_v48 = vcombine.high %v1010_v38, %v1010_v38 }
 0x128   :  { %v319_v55 = vmul.f32 %v311_v42, %v1380_v49  ;;  %v329_v56 = vpack.c.bf16 %v321_v51, %v320_v50  ;;  %v315_v62 = vmul.f32 %v307_v53, %v1380_v49  ;;  %v327_v63 = vpack.c.bf16 %v317_v57, %v316_v60 }
 0x129   :  { %v505_v50 = vrot.slane %v494_v39, %v1361_v6 }
 0x12a   :  { %1110 = vmatprep.subr.bf16.mxu1 %v329_v56  ;;  %v328_v58 = vpack.c.bf16 %v319_v55, %v318_v54  ;;  %v326_v7 = vpack.c.bf16 %v315_v62, %v314_v2  ;;  %v460_v54 = vrot.slane %v446_v48, %v1359_v5 }
 0x12b   :  { %1111 = vmatpush3.bf16.msra.mxu1 %v329_v56 }
 0x12c   :  { %1112 = vmatprep.subr.bf16.mxu1 %v328_v58  ;;  %v468_v59 = vrot.slane %v460_v54, %v1361_v6 }
 0x12f   :  { %1113 = vmatpush3.bf16.msra.mxu1 %v328_v58 }
 0x130   :  { %1114 = vmatprep.subr.bf16.mxu1 %v327_v63 }
 0x133   :  { %1115 = vmatpush3.bf16.msra.mxu1 %v327_v63 }
 0x134   :  { %1116 = vmatprep.subr.bf16.mxu1 %v326_v7 }
 0x137   :  { %1117 = vmatpush3.bf16.msra.mxu1 %v326_v7 }
 0x138   :  { %1118 = vmatprep.subr.bf16.mxu1 %v325_v12 }
 0x13b   :  { %1119 = vmatpush3.bf16.msra.mxu1 %v325_v12 }
 0x13c   :  { %1120 = vmatprep.subr.bf16.mxu1 %v324_v16 }
 0x13f   :  { %1121 = vmatpush3.bf16.msra.mxu1 %v324_v16  ;;  %v1224_v16 = vld [vmem:[#allocation5 + $0x48] sm:$0xff]  }
 0x140   :  { %1122 = vmatprep.subr.bf16.mxu1 %v323_v19 }
 0x143   :  { %1123 = vmatpush3.bf16.msra.mxu1 %v323_v19  ;;  %v1227_v19 = vld [vmem:[#allocation5 + $0x60] sm:$0xff]  }
 0x144   :  { %1124 = vmatprep.subr.bf16.mxu1 %v322_v21 }
 0x147   :  { %1125 = vmatpush3.bf16.msra.mxu1 %v322_v21  ;;  %v1017_v21 = vld.sshfl [vmem:[#allocation2 + $0x8] sm:$0x11 pattern:$0x75316420] }
 0x14a   :  { %1127 = vmatmul.mubr.bf16.vlgmr.msra.gmra.mxu1 %v1220_v22 }
 0x14b   :  { %1130 = vmatprep.mubr.bf16.mxu1 %v1221_v23  ;;  %v685_v23 = vcombine.high %v1017_v21, %v1017_v21 }
 0x152   :  { %1131 = vmatmul.mubr.bf16.gmra.mxu1 %v1222_v24 }
 0x153   :  { %1174 = vmatprep.mubr.bf16.mxu1 %v1227_v19 }
 0x20a   :  { %v1128_v26 = vpop.f32.mrf.mxu1 }
 0x20b   :  { %v1439_v58 = vadd.f32 %v1128_v26, %v1393_v0  ;;  %v699_v26 = vrot.slane %v685_v23, %v1359_v5 }
 0x20c   :  { %v397_v28 = vpop.f32.mrf.mxu1 }
 0x20d   :  { %v477_v2 = vmul.f32 %v468_v59, %v1439_v58  ;;  %v1450_v3 = vadd.f32 %v397_v28, %v1402_v10 }
 0x20e   :  { %v1129_v30 = vpop.f32.mrf.mxu1 }
 0x20f   :  { %v475_v9 = vmul.f32 %v468_v59, %v1450_v3 }
 0x210   :  { %v400_v31 = vpop.f32.mrf.mxu1 }
 0x211   :  { %v1445_v63 = vadd.f32 %v400_v31, %v1398_v4 }
 0x212   :  { %v1132_v33 = vpop.f32.mrf.mxu1 }
 0x213   :  { %v1413_v35 = vadd.f32 %v1132_v33, %v1372_v41  ;;  %v476_v0 = vmul.f32 %v468_v59, %v1445_v63  ;;  %v692_v33 = vrot.slane %v1017_v21, %v1359_v5 }
 0x214   :  { %v413_v34 = vpop.f32.mrf.mxu1 }
 0x215   :  { %v1418_v40 = vadd.f32 %v413_v34, %v1376_v46  ;;  %v518_v44 = vmul.f32 %v509_v36, %v1413_v35  ;;  %v514_v55 = vmul.f32 %v505_v50, %v1413_v35  ;;  %v522_v11 = vpack.c.bf16 %v476_v0, %v475_v9 }
 0x216   :  { %v1133_v37 = vpop.f32.mrf.mxu1 }
 0x217   :  { %v1421_v42 = vadd.f32 %v1133_v37, %v1378_v47  ;;  %v516_v51 = vmul.f32 %v509_v36, %v1418_v40  ;;  %v512_v60 = vmul.f32 %v505_v50, %v1418_v40 }
 0x218   :  { %v416_v43 = vpop.f32.mrf.mxu1 }
 0x219   :  { %v519_v45 = vmul.f32 %v509_v36, %v1421_v42  ;;  %v1426_v41 = vadd.f32 %v416_v43, %v1380_v49  ;;  %v515_v53 = vmul.f32 %v505_v50, %v1421_v42  ;;  %v1435_v49 = vadd.f32 %v1129_v30, %v1390_v61 }
 0x21a   :  { %v453_v61 = vrot.slane %v1010_v38, %v1359_v5  ;;  %v1464_v30 = vrot.slane %v699_v26, %v1361_v6  ;;  %v644_v43 = vcombine.high %v1016_v32, %v1016_v32 }
 0x21b   :  { %v517_v52 = vmul.f32 %v509_v36, %v1426_v41  ;;  %v527_v46 = vpack.c.bf16 %v519_v45, %v518_v44  ;;  %v513_v56 = vmul.f32 %v505_v50, %v1426_v41  ;;  %v525_v57 = vpack.c.bf16 %v515_v53, %v514_v55 }
 0x21c   :  { %v478_v62 = vmul.f32 %v468_v59, %v1435_v49  ;;  %v464_v8 = vrot.slane %v453_v61, %v1361_v6  ;;  %v1481_v44 = vrot.slane %v692_v33, %v1361_v6 }
 0x21d   :  { %1134 = vmatprep.subr.bf16.mxu0 %v527_v46  ;;  %v526_v47 = vpack.c.bf16 %v517_v52, %v516_v51  ;;  %v524_v1 = vpack.c.bf16 %v513_v56, %v512_v60 }
 0x21e   :  { %1135 = vmatpush3.bf16.msra.mxu0 %v527_v46  ;;  %v523_v7 = vpack.c.bf16 %v478_v62, %v477_v2  ;;  %v474_v4 = vmul.f32 %v464_v8, %v1435_v49  ;;  %v473_v12 = vmul.f32 %v464_v8, %v1439_v58  ;;  %v472_v10 = vmul.f32 %v464_v8, %v1445_v63 }
 0x21f   :  { %1136 = vmatprep.subr.bf16.mxu0 %v526_v47  ;;  %v471_v14 = vmul.f32 %v464_v8, %v1450_v3 }
 0x220   :  { %v521_v13 = vpack.c.bf16 %v474_v4, %v473_v12  ;;  %v1231_v12 = vld [vmem:[#allocation7] sm:$0xff]  }
 0x221   :  { %v520_v15 = vpack.c.bf16 %v472_v10, %v471_v14  ;;  %v1232_v10 = vld [vmem:[#allocation7 + $0x10] sm:$0xff]  }
 0x222   :  { %1137 = vmatpush3.bf16.msra.mxu0 %v526_v47 }
 0x223   :  { %1138 = vmatprep.subr.bf16.mxu0 %v525_v57 }
 0x226   :  { %1139 = vmatpush3.bf16.msra.mxu0 %v525_v57 }
 0x227   :  { %1140 = vmatprep.subr.bf16.mxu0 %v524_v1 }
 0x22a   :  { %1141 = vmatpush3.bf16.msra.mxu0 %v524_v1 }
 0x22b   :  { %1142 = vmatprep.subr.bf16.mxu0 %v523_v7 }
 0x22e   :  { %1143 = vmatpush3.bf16.msra.mxu0 %v523_v7 }
 0x22f   :  { %1144 = vmatprep.subr.bf16.mxu0 %v522_v11 }
 0x232   :  { %1145 = vmatpush3.bf16.msra.mxu0 %v522_v11  ;;  %v1229_v11 = vld [vmem:[#allocation5 + $0x70] sm:$0xff]  }
 0x233   :  { %1146 = vmatprep.subr.bf16.mxu0 %v521_v13 }
 0x236   :  { %1147 = vmatpush3.bf16.msra.mxu0 %v521_v13 }
 0x237   :  { %1148 = vmatprep.subr.bf16.mxu0 %v520_v15 }
 0x23a   :  { %1149 = vmatpush3.bf16.msra.mxu0 %v520_v15 }
 0x23d   :  { %1151 = vmatmul.mubr.bf16.vlgmr.msra.gmra.mxu0 %v1224_v16 }
 0x23e   :  { %1154 = vmatprep.mubr.bf16.mxu0 %v1225_v17 }
 0x245   :  { %1155 = vmatmul.mubr.bf16.gmra.mxu0 %v1226_v18 }
 0x246   :  { %1190 = vmatprep.mubr.msk.bf16.mxu0 %vm872_vm0, %v1231_v12 }
 0x2fd   :  { %v1152_v20 = vpop.f32.mrf.mxu0 }
 0x2fe   :  { %v628_v47 = vadd.f32 %v1152_v20, %v1439_v58 }
 0x2ff   :  { %v595_v22 = vpop.f32.mrf.mxu0 }
 0x300   :  { %v626_v62 = vadd.f32 %v595_v22, %v1450_v3  ;;  %v1228_v3 = vld [vmem:[#allocation5 + $0x68] sm:$0xff]  }
 0x301   :  { %v1153_v24 = vpop.f32.mrf.mxu0 }
 0x302   :  { %v629_v52 = vadd.f32 %v1153_v24, %v1435_v49  ;;  %v651_v49 = vrot.slane %v1016_v32, %v1359_v5 }
 0x303   :  { %v598_v25 = vpop.f32.mrf.mxu0 }
 0x304   :  { %v627_v57 = vadd.f32 %v598_v25, %v1445_v63  ;;  %v662_v58 = vrot.slane %v651_v49, %v1361_v6 }
 0x305   :  { %v1156_v27 = vpop.f32.mrf.mxu0 }
 0x306   :  { %v1461_v29 = vadd.f32 %v1156_v27, %v1413_v35  ;;  %v672_v0 = vmul.f32 %v662_v58, %v629_v52  ;;  %v671_v8 = vmul.f32 %v662_v58, %v628_v47  ;;  %v670_v63 = vmul.f32 %v662_v58, %v627_v57 }
 0x307   :  { %v611_v28 = vpop.f32.mrf.mxu0 }
 0x308   :  { %v1468_v34 = vadd.f32 %v611_v28, %v1418_v40  ;;  %v716_v38 = vmul.f32 %v1464_v30, %v1461_v29  ;;  %v712_v51 = vmul.f32 %v1481_v44, %v1461_v29  ;;  %v719_v9 = vpack.c.bf16 %v672_v0, %v671_v8 }
 0x309   :  { %v1157_v31 = vpop.f32.mrf.mxu0 }
 0x30a   :  { %v1471_v36 = vadd.f32 %v1157_v31, %v1421_v42  ;;  %v714_v40 = vmul.f32 %v1464_v30, %v1468_v34  ;;  %v710_v55 = vmul.f32 %v1481_v44, %v1468_v34 }
 0x30b   :  { %v614_v37 = vpop.f32.mrf.mxu0 }
 0x30c   :  { %v717_v35 = vmul.f32 %v1464_v30, %v1471_v36  ;;  %v1478_v39 = vadd.f32 %v614_v37, %v1426_v41  ;;  %v713_v48 = vmul.f32 %v1481_v44, %v1471_v36  ;;  %v658_v41 = vrot.slane %v644_v43, %v1359_v5  ;;  %v1233_v37 = vld [vmem:[#allocation7 + $0x8] sm:$0xff]  }
 0x30d   :  { %v669_v5 = vmul.f32 %v662_v58, %v626_v62 }
 0x30e   :  { %v715_v42 = vmul.f32 %v1464_v30, %v1478_v39  ;;  %v725_v45 = vpack.c.bf16 %v717_v35, %v716_v38  ;;  %v711_v46 = vmul.f32 %v1481_v44, %v1478_v39  ;;  %v723_v53 = vpack.c.bf16 %v713_v48, %v712_v51  ;;  %v1234_v38 = vld [vmem:[#allocation7 + $0x18] sm:$0xff]  }
 0x30f   :  { %v666_v54 = vrot.slane %v658_v41, %v1361_v6  ;;  %v718_v4 = vpack.c.bf16 %v670_v63, %v669_v5  ;;  %v1230_v6 = vld [vmem:[#allocation5 + $0x78] sm:$0xff]  }
 0x310   :  { %1158 = vmatprep.subr.bf16.mxu1 %v725_v45  ;;  %v724_v50 = vpack.c.bf16 %v715_v42, %v714_v40  ;;  %v722_v59 = vpack.c.bf16 %v711_v46, %v710_v55 }
 0x311   :  { %1159 = vmatpush3.bf16.msra.mxu1 %v725_v45  ;;  %v676_v56 = vmul.f32 %v666_v54, %v629_v52  ;;  %v675_v60 = vmul.f32 %v666_v54, %v628_v47  ;;  %v674_v1 = vmul.f32 %v666_v54, %v627_v57  ;;  %v673_v2 = vmul.f32 %v666_v54, %v626_v62 }
 0x312   :  { %1160 = vmatprep.subr.bf16.mxu1 %v724_v50 }
 0x313   :  { %v721_v61 = vpack.c.bf16 %v676_v56, %v675_v60  ;;  %v720_v7 = vpack.c.bf16 %v674_v1, %v673_v2 }
 0x315   :  { %1161 = vmatpush3.bf16.msra.mxu1 %v724_v50 }
 0x316   :  { %1162 = vmatprep.subr.bf16.mxu1 %v723_v53 }
 0x319   :  { %1163 = vmatpush3.bf16.msra.mxu1 %v723_v53 }
 0x31a   :  { %1164 = vmatprep.subr.bf16.mxu1 %v722_v59 }
 0x31d   :  { %1165 = vmatpush3.bf16.msra.mxu1 %v722_v59 }
 0x31e   :  { %1166 = vmatprep.subr.bf16.mxu1 %v721_v61 }
 0x321   :  { %1167 = vmatpush3.bf16.msra.mxu1 %v721_v61 }
 0x322   :  { %1168 = vmatprep.subr.bf16.mxu1 %v720_v7 }
 0x325   :  { %1169 = vmatpush3.bf16.msra.mxu1 %v720_v7 }
 0x326   :  { %1170 = vmatprep.subr.bf16.mxu1 %v719_v9 }
 0x329   :  { %1171 = vmatpush3.bf16.msra.mxu1 %v719_v9 }
 0x32a   :  { %1172 = vmatprep.subr.bf16.mxu1 %v718_v4 }
 0x32d   :  { %1173 = vmatpush3.bf16.msra.mxu1 %v718_v4 }
 0x330   :  { %1175 = vmatmul.mubr.bf16.vlgmr.msra.gmra.mxu1 %v1228_v3 }
 0x331   :  { %1178 = vmatprep.mubr.bf16.mxu1 %v1229_v11 }
 0x338   :  { %1179 = vmatmul.mubr.bf16.gmra.mxu1 %v1230_v6 }
 0x339   :  { %1194 = vmatprep.mubr.msk.bf16.mxu1 %vm872_vm0, %v1232_v10 }
 0x3f0   :  { %v1176_v13 = vpop.f32.mrf.mxu1 }
 0x3f1   :  { %v826_v15 = vadd.f32 %v1176_v13, %v628_v47 }
 0x3f2   :  { %v793_v14 = vpop.f32.mrf.mxu1 }
 0x3f3   :  { %v824_v17 = vadd.f32 %v793_v14, %v626_v62  ;;  %v838_v20 = vmul.f32 %v826_v15, %v1464_v30  ;;  %v834_v28 = vmul.f32 %v826_v15, %v1481_v44 }
 0x3f4   :  { %v1177_v16 = vpop.f32.mrf.mxu1 }
 0x3f5   :  { %v827_v18 = vadd.f32 %v1177_v16, %v629_v52  ;;  %v836_v23 = vmul.f32 %v824_v17, %v1464_v30  ;;  %v832_v33 = vmul.f32 %v824_v17, %v1481_v44 }
 0x3f6   :  { %v796_v19 = vpop.f32.mrf.mxu1 }
 0x3f7   :  { %v839_v21 = vmul.f32 %v827_v18, %v1464_v30  ;;  %v825_v22 = vadd.f32 %v796_v19, %v627_v57  ;;  %v835_v26 = vmul.f32 %v827_v18, %v1481_v44 }
 0x3f8   :  { %v1180_v35 = vpop.f32.mrf.mxu1 }
 0x3f9   :  { %v843_v24 = vpack.c.bf16 %v839_v21, %v838_v20  ;;  %v837_v25 = vmul.f32 %v825_v22, %v1464_v30  ;;  %v841_v31 = vpack.c.bf16 %v835_v26, %v834_v28  ;;  %v833_v32 = vmul.f32 %v825_v22, %v1481_v44 }
 0x3fa   :  { %v809_v43 = vpop.f32.mrf.mxu1  ;;  %v830_v53 = vadd.f32 %v1180_v35, %v1461_v29 }
 0x3fb   :  { %v842_v27 = vpack.c.bf16 %v837_v25, %v836_v23  ;;  %1182 = vmatprep.subr.bf16.mxu0 %v843_v24  ;;  %1198 = vmatprep.subr.bf16.mxu1 %v843_v24  ;;  %v840_v30 = vpack.c.bf16 %v833_v32, %v832_v33  ;;  %v828_v52 = vadd.f32 %v809_v43, %v1468_v34 }
 0x3fc   :  { %1183 = vmatpush3.bf16.msra.mxu0 %v843_v24  ;;  %1202 = vmatpush3.bf16.msra.mxu1 %v843_v24  ;;  %v1181_v40 = vpop.f32.mrf.mxu1 }
 0x3fd   :  { %1184 = vmatprep.subr.bf16.mxu0 %v842_v27  ;;  %1199 = vmatprep.subr.bf16.mxu1 %v842_v27  ;;  %v831_v49 = vadd.f32 %v1181_v40, %v1471_v36 }
 0x3fe   :  { %v812_v42 = vpop.f32.mrf.mxu1 }
 0x3ff   :  { %v829_v46 = vadd.f32 %v812_v42, %v1478_v39 }
 0x400   :  { %1185 = vmatpush3.bf16.msra.mxu0 %v842_v27  ;;  %1203 = vmatpush3.bf16.msra.mxu1 %v842_v27 }
 0x401   :  { %1186 = vmatprep.subr.bf16.mxu0 %v841_v31  ;;  %1200 = vmatprep.subr.bf16.mxu1 %v841_v31 }
 0x404   :  { %1187 = vmatpush3.bf16.msra.mxu0 %v841_v31  ;;  %1204 = vmatpush3.bf16.msra.mxu1 %v841_v31 }
 0x405   :  { %1188 = vmatprep.subr.bf16.mxu0 %v840_v30  ;;  %1201 = vmatprep.subr.bf16.mxu1 %v840_v30 }
 0x408   :  { %1189 = vmatpush3.bf16.msra.mxu0 %v840_v30  ;;  %1205 = vmatpush3.bf16.msra.mxu1 %v840_v30 }
 0x40b   :  { %1191 = vmatmul.mubr.msk.bf16.vlgmr.msra.gmra.mxu0 %vm872_vm0, %v1233_v37  ;;  %1195 = vmatmul.mubr.msk.bf16.vlgmr.msra.gmra.mxu1 %vm872_vm0, %v1234_v38 }
 0x4cb   :  { %v1192_v44 = vpop.f32.mrf.mxu0  ;;  %v1196_v45 = vpop.f32.mrf.mxu1 }
 0x4cc   :  { %v952_v60 = vmul.f32 %v1192_v44, %v830_v53  ;;  %v956_v62 = vmul.f32 %v1196_v45, %v830_v53 }
 0x4cd   :  { %v919_v48 = vpop.f32.mrf.mxu0  ;;  %v935_v50 = vpop.f32.mrf.mxu1 }
 0x4ce   :  { %v950_v55 = vmul.f32 %v919_v48, %v828_v52  ;;  %v954_v56 = vmul.f32 %v935_v50, %v828_v52 }
 0x4cf   :  { %v1193_v41 = vpop.f32.mrf.mxu0  ;;  %v1197_v51 = vpop.f32.mrf.mxu1 }
 0x4d0   :  { %v953_v58 = vmul.f32 %v1193_v41, %v831_v49  ;;  %v957_v2 = vmul.f32 %v1197_v51, %v831_v49 }
 0x4d1   :  { %v922_v47 = vpop.f32.mrf.mxu0  ;;  %v938_v54 = vpop.f32.mrf.mxu1 }
 0x4d2   :  { %v951_v57 = vmul.f32 %v922_v47, %v829_v46  ;;  %v955_v59 = vmul.f32 %v938_v54, %v829_v46 }
 0x4d4   :  { %v958_v1 = vadd.f32 %v951_v57, %v950_v55  ;;  %v967_v61 = vadd.f32 %v955_v59, %v954_v56 }
 0x4d6   :  { %v959_v0 = vadd.f32 %v958_v1, %v952_v60  ;;  %v968_v34 = vadd.f32 %v967_v61, %v956_v62 }
 0x4d8   :  { %v960_v7 = vadd.f32 %v959_v0, %v953_v58  ;;  %v969_v39 = vadd.f32 %v968_v34, %v957_v2 }
 0x4da   :  { %v961_v8 = vrot.slane %v960_v7, 4  ;;  %v970_v29 = vrot.slane %v969_v39, 4 }
 0x4dc   :  { %v962_v63 = vadd.f32 %v961_v8, %v960_v7  ;;  %v971_v9 = vadd.f32 %v970_v29, %v969_v39 }
 0x4de   :  { %v963_v5 = vrot.slane %v962_v63, 2  ;;  %v972_v4 = vrot.slane %v971_v9, 2 }
 0x4e0   :  { %v964_v3 = vadd.f32 %v963_v5, %v962_v63  ;;  %v973_v11 = vadd.f32 %v972_v4, %v971_v9 }
 0x4e2   :  { %v965_v6 = vrot.slane %v964_v3, 1  ;;  %v974_v36 = vrot.slane %v973_v11, 1 }
 0x4e4   :  { %v966_v12 = vadd.f32 %v965_v6, %v964_v3  ;;  %v975_v10 = vadd.f32 %v974_v36, %v973_v11 }
 0x4e6   :  { %v979_v13 = vsel %vm978_vm1, %v975_v10, %v966_v12 }
 0x4e7   :  { %981 = vst [vmem:[#allocation8] sm:$0x3] %v979_v13 }
 0x4e8   :  { %1306 = shalt.err (!%p1303_p5)
}
 0x4e9   :  { %991 = dma.vmem_to_hbm [thread:$0]  %s989_s2, 32, %s1525_s3, [#allocation4]  }
 0x4ea   :  { %1319 = dma.done.wait [#allocation4], 32  }
 0x4eb   :  { %1320 = vsyncadd [#allocation4], 4294967264 }
 0x4ec   :  { %995 = vsyncpa [#allocation3], 1 }
 0x4ed   :  { %996 = vsyncpa [#allocation6], 1 }
 0x4ee   :  { %997 = vsyncpa [#allocation4], 1 }

</bundles_post_ra>
